<compile_context>
chip_gen: v7x
topology: tpu7x:2x2x1
jax: 0.10.0
libtpu: 0.0.40
codegen_flags: <defaults>
</compile_context>

<pallas_src>
import math
from functools import partial

import jax
import jax.numpy as jnp
from jax.experimental import pallas as pl
from jax.experimental.pallas import tpu as pltpu


def _round_up(x, m):
    return ((x + m - 1) // m) * m


def _flash_attn_kernel(q_ref, k_ref, v_ref, o_ref, q_sc, m_sc, l_sc, acc_sc, *,
                       H, E, scale, kv_len, need_mask, mm_dtype, approx_recip):
    ki = pl.program_id(2)
    n_k = pl.num_programs(2)
    tq = q_ref.shape[1]
    tk = k_ref.shape[1]

    @pl.when(ki == 0)
    def _init():
        # Init online-softmax state and pre-process q once per q-tile:
        # fold 1/sqrt(d_keys), go head-major (H, tq, E), cast to MXU dtype.
        m_sc[...] = jnp.full_like(m_sc, -1e30)
        l_sc[...] = jnp.zeros_like(l_sc)
        acc_sc[...] = jnp.zeros_like(acc_sc)
        q = (q_ref[0].astype(jnp.float32) * scale).reshape(tq, H, E)
        q_sc[...] = jnp.swapaxes(q, 0, 1).astype(q_sc.dtype)

    q = q_sc[...]                                                        # (H, tq, E)
    k = jnp.swapaxes(k_ref[0].astype(mm_dtype).reshape(tk, H, E), 0, 1)  # (H, tk, E)
    v = jnp.swapaxes(v_ref[0].astype(mm_dtype).reshape(tk, H, E), 0, 1)  # (H, tk, E)

    # scores for this KV tile, all heads at once (MXU, f32 accumulation)
    s = jnp.einsum("hqe,hke->hqk", q, k,
                   preferred_element_type=jnp.float32)                   # (H, tq, tk)

    if need_mask:
        key_idx = jax.lax.broadcasted_iota(jnp.int32, (1, 1, tk), 2) + ki * tk
        s = jnp.where(key_idx < kv_len, s, -1e30)

    # online softmax update (stats in f32)
    m_prev = m_sc[...]
    m_new = jnp.maximum(m_prev, jnp.max(s, axis=-1, keepdims=True))      # (H, tq, 1)
    alpha = jnp.exp(m_prev - m_new)
    p = jnp.exp(s - m_new)                                               # (H, tq, tk)

    l_sc[...] = alpha * l_sc[...] + jnp.sum(p, axis=-1, keepdims=True)
    acc_sc[...] = alpha * acc_sc[...] + jnp.einsum(
        "hqk,hke->hqe", p.astype(mm_dtype), v,
        preferred_element_type=jnp.float32)                              # (H, tq, E)
    m_sc[...] = m_new

    # TODO(synk): training-time attention dropout (pltpu.prng_seed +
    # prng_random_bits mask on `p`) not implemented; inference dropout is identity.

    @pl.when(ki == n_k - 1)
    def _finalize():
        inv_l = pl.reciprocal(l_sc[...], approx=approx_recip)            # (H, tq, 1)
        out = acc_sc[...] * inv_l                                        # (H, tq, E)
        out = jnp.swapaxes(out, 0, 1).reshape(tq, H * E)                 # lane-dense
        o_ref[0] = out.astype(o_ref.dtype)


def softmax_attention(queries, keys, values, d_keys, attention_dropout=0.0, *,
                      use_bf16_matmul=True, block_q=None, block_k=None):
    """queries/keys/values: (B, L, H, E). Returns (B, L, H, E)."""
    del attention_dropout  # inference: dropout is identity
    B, L, H, E = queries.shape
    assert E == d_keys
    HE = H * E

    # Free, contiguous reshapes (no transposes, no extra HBM passes).
    q = queries.reshape(B, L, HE)
    k = keys.reshape(B, L, HE)
    v = values.reshape(B, L, HE)

    L8 = _round_up(L, 8)
    tq = _round_up(min(block_q or 128, L8), 8)
    tk = _round_up(min(block_k or 256, L8), 8)
    Lq = _round_up(L, tq)
    Lk = _round_up(L, tk)

    if Lq != L:
        q = jnp.pad(q, ((0, 0), (0, Lq - L), (0, 0)))
    if Lk != L:
        k = jnp.pad(k, ((0, 0), (0, Lk - L), (0, 0)))
        v = jnp.pad(v, ((0, 0), (0, Lk - L), (0, 0)))

    n_q = Lq // tq
    n_k = Lk // tk
    scale = 1.0 / math.sqrt(d_keys)
    mm_dtype = jnp.bfloat16 if use_bf16_matmul else jnp.float32

    kernel = partial(
        _flash_attn_kernel,
        H=H, E=E, scale=scale, kv_len=L, need_mask=(Lk != L),
        mm_dtype=mm_dtype, approx_recip=use_bf16_matmul,
    )

    out = pl.pallas_call(
        kernel,
        out_shape=jax.ShapeDtypeStruct((B, Lq, HE), queries.dtype),
        grid_spec=pltpu.PrefetchScalarGridSpec(
            num_scalar_prefetch=0,
            grid=(B, n_q, n_k),
            in_specs=[
                pl.BlockSpec((1, tq, HE), lambda b, qi, ki: (b, qi, 0)),
                pl.BlockSpec((1, tk, HE), lambda b, qi, ki: (b, ki, 0)),
                pl.BlockSpec((1, tk, HE), lambda b, qi, ki: (b, ki, 0)),
            ],
            out_specs=pl.BlockSpec((1, tq, HE), lambda b, qi, ki: (b, qi, 0)),
            scratch_shapes=[
                pltpu.VMEM((H, tq, E), mm_dtype),      # pre-processed q tile
                pltpu.VMEM((H, tq, 1), jnp.float32),   # running max
                pltpu.VMEM((H, tq, 1), jnp.float32),   # running denominator
                pltpu.VMEM((H, tq, E), jnp.float32),   # output accumulator
            ],
        ),
        compiler_params=pltpu.CompilerParams(
            dimension_semantics=("parallel", "parallel", "arbitrary"),
            vmem_limit_bytes=32 * 1024 * 1024,
        ),
    )(q, k, v)

    # Drop query padding and split heads back out (free reshapes/slices).
    return out[:, :L, :].reshape(B, L, H, E)


def _reference(queries, keys, values, d_keys):
    q = jnp.transpose(queries, (0, 2, 1, 3)).astype(jnp.float32)
    k = jnp.transpose(keys, (0, 2, 1, 3)).astype(jnp.float32)
    v = jnp.transpose(values, (0, 2, 1, 3)).astype(jnp.float32)
    dot = jnp.einsum("bhle,bhme->bhlm", q, k) / math.sqrt(d_keys)
    attn = jax.nn.softmax(dot, axis=-1)
    out = jnp.einsum("bhlm,bhme->bhle", attn, v)
    return jnp.transpose(out, (0, 2, 1, 3)).astype(queries.dtype)


if __name__ == "__main__":
    key = jax.random.PRNGKey(0)
    kq, kk, kv, kq2, kk2, kv2 = jax.random.split(key, 6)

    # Primary config: B=2, L=8, H=4, E=32 (lane dim H*E = 128).
    B, L, H, E = 2, 8, 4, 32
    queries = jax.random.normal(kq, (B, L, H, E), dtype=jnp.float32)
    keys = jax.random.normal(kk, (B, L, H, E), dtype=jnp.float32)
    values = jax.random.normal(kv, (B, L, H, E), dtype=jnp.float32)
    ref = _reference(queries, keys, values, d_keys=E)

    # Default path: bf16 MXU inputs, f32 accumulation & softmax stats.
    out = softmax_attention(queries, keys, values, d_keys=E,
                            attention_dropout=0.1)
    out = jax.block_until_ready(out)
    assert out.shape == (B, L, H, E)
    assert jnp.allclose(out, ref, atol=5e-2, rtol=5e-2), "bf16 path mismatch"

    # Full-f32 path: tight check of the flash / online-softmax logic.
    out_f32 = softmax_attention(queries, keys, values, d_keys=E,
                                use_bf16_matmul=False)
    out_f32 = jax.block_until_ready(out_f32)
    assert jnp.allclose(out_f32, ref, atol=1e-4, rtol=1e-4), "f32 path mismatch"

    # Multi-KV-tile + padded/masked path (L not a multiple of the tile).
    B2, L2 = 2, 20
    q2 = jax.random.normal(kq2, (B2, L2, H, E), dtype=jnp.float32)
    k2 = jax.random.normal(kk2, (B2, L2, H, E), dtype=jnp.float32)
    v2 = jax.random.normal(kv2, (B2, L2, H, E), dtype=jnp.float32)
    out2 = softmax_attention(q2, k2, v2, d_keys=E, use_bf16_matmul=False,
                             block_q=8, block_k=8)
    out2 = jax.block_until_ready(out2)
    ref2 = _reference(q2, k2, v2, d_keys=E)
    assert jnp.allclose(out2, ref2, atol=1e-4, rtol=1e-4), "masked path mismatch"

    print("KERNEL_OK")
</pallas_src>

<mosaic_0001>
module attributes {stable_mosaic.version = 11 : i64} {
  func.func @_flash_attn_kernel(%arg0: i32, %arg1: i32, %arg2: i32, %arg3: memref<1x8x128xf32, #tpu.memory_space<vmem>>, %arg4: memref<1x8x128xf32, #tpu.memory_space<vmem>>, %arg5: memref<1x8x128xf32, #tpu.memory_space<vmem>>, %arg6: memref<1x8x128xf32, #tpu.memory_space<vmem>>, %arg7: memref<4x8x32xbf16, #tpu.memory_space<vmem>>, %arg8: memref<4x8x1xf32, #tpu.memory_space<vmem>>, %arg9: memref<4x8x1xf32, #tpu.memory_space<vmem>>, %arg10: memref<4x8x32xf32, #tpu.memory_space<vmem>>) attributes {dimension_semantics = [#tpu.dimension_semantics<parallel>, #tpu.dimension_semantics<parallel>, #tpu.dimension_semantics<arbitrary>], iteration_bounds = array<i64: 2, 1, 1>, scalar_prefetch = 0 : i64, scratch_operands = 4 : i64, tpu.core_type = #tpu.core_type<tc>, window_params = [{transform_indices = @transform_0, window_bounds = array<i64: 1, 8, 128>}, {transform_indices = @transform_1, window_bounds = array<i64: 1, 8, 128>}, {transform_indices = @transform_2, window_bounds = array<i64: 1, 8, 128>}, {transform_indices = @transform_3, window_bounds = array<i64: 1, 8, 128>}]} {
    %c0_i32 = arith.constant 0 : i32
    %0 = arith.cmpi eq, %arg2, %c0_i32 : i32
    %1 = arith.extui %0 : i1 to i32
    %c0_i32_0 = arith.constant 0 : i32
    %2 = arith.cmpi ne, %1, %c0_i32_0 : i32
    scf.if %2 {
      %cst_32 = arith.constant -1.000000e+30 : f32
      %41 = vector.broadcast %cst_32 : f32 to vector<4x8x1xf32>
      %c0_33 = arith.constant 0 : index
      %c0_34 = arith.constant 0 : index
      %c0_35 = arith.constant 0 : index
      %42 = vector.load %arg8[%c0_33, %c0_34, %c0_35] : memref<4x8x1xf32, #tpu.memory_space<vmem>>, vector<4x8x1xf32>
      tpu.vector_store %arg8[%c0_33, %c0_34, %c0_35], %41 {strides = array<i32>} : memref<4x8x1xf32, #tpu.memory_space<vmem>>, vector<4x8x1xf32>,
      %cst_36 = arith.constant 0.000000e+00 : f32
      %43 = vector.broadcast %cst_36 : f32 to vector<4x8x1xf32>
      %c0_37 = arith.constant 0 : index
      %c0_38 = arith.constant 0 : index
      %c0_39 = arith.constant 0 : index
      %44 = vector.load %arg9[%c0_37, %c0_38, %c0_39] : memref<4x8x1xf32, #tpu.memory_space<vmem>>, vector<4x8x1xf32>
      tpu.vector_store %arg9[%c0_37, %c0_38, %c0_39], %43 {strides = array<i32>} : memref<4x8x1xf32, #tpu.memory_space<vmem>>, vector<4x8x1xf32>,
      %cst_40 = arith.constant 0.000000e+00 : f32
      %45 = vector.broadcast %cst_40 : f32 to vector<4x8x32xf32>
      %c0_41 = arith.constant 0 : index
      %c0_42 = arith.constant 0 : index
      %c0_43 = arith.constant 0 : index
      %46 = vector.load %arg10[%c0_41, %c0_42, %c0_43] : memref<4x8x32xf32, #tpu.memory_space<vmem>>, vector<4x8x32xf32>
      tpu.vector_store %arg10[%c0_41, %c0_42, %c0_43], %45 {strides = array<i32>} : memref<4x8x32xf32, #tpu.memory_space<vmem>>, vector<4x8x32xf32>,
      %c0_44 = arith.constant 0 : index
      %c0_45 = arith.constant 0 : index
      %c0_46 = arith.constant 0 : index
      %47 = vector.load %arg3[%c0_44, %c0_45, %c0_46] : memref<1x8x128xf32, #tpu.memory_space<vmem>>, vector<1x8x128xf32>
      %48 = vector.shape_cast %47 : vector<1x8x128xf32> to vector<8x128xf32>
      %cst_47 = arith.constant 0.176776692 : f32
      %49 = vector.broadcast %cst_47 : f32 to vector<8x128xf32>
      %50 = arith.mulf %48, %49 : vector<8x128xf32>
      %51 = vector.shape_cast %50 : vector<8x128xf32> to vector<8x4x32xf32>
      %52 = tpu.transpose %51, [1, 0, 2] : vector<8x4x32xf32> -> vector<4x8x32xf32>
      %53 = arith.truncf %52 : vector<4x8x32xf32> to vector<4x8x32xbf16>
      %c0_48 = arith.constant 0 : index
      %c0_49 = arith.constant 0 : index
      %c0_50 = arith.constant 0 : index
      %54 = vector.load %arg7[%c0_48, %c0_49, %c0_50] : memref<4x8x32xbf16, #tpu.memory_space<vmem>>, vector<4x8x32xbf16>
      tpu.vector_store %arg7[%c0_48, %c0_49, %c0_50], %53 {strides = array<i32>} : memref<4x8x32xbf16, #tpu.memory_space<vmem>>, vector<4x8x32xbf16>,
    } else {
    }
    %c0 = arith.constant 0 : index
    %c0_1 = arith.constant 0 : index
    %c0_2 = arith.constant 0 : index
    %3 = vector.load %arg7[%c0, %c0_1, %c0_2] : memref<4x8x32xbf16, #tpu.memory_space<vmem>>, vector<4x8x32xbf16>
    %c0_3 = arith.constant 0 : index
    %c0_4 = arith.constant 0 : index
    %c0_5 = arith.constant 0 : index
    %4 = vector.load %arg4[%c0_3, %c0_4, %c0_5] : memref<1x8x128xf32, #tpu.memory_space<vmem>>, vector<1x8x128xf32>
    %5 = vector.shape_cast %4 : vector<1x8x128xf32> to vector<8x128xf32>
    %6 = arith.truncf %5 : vector<8x128xf32> to vector<8x128xbf16>
    %7 = vector.shape_cast %6 : vector<8x128xbf16> to vector<8x4x32xbf16>
    %8 = tpu.transpose %7, [1, 0, 2] : vector<8x4x32xbf16> -> vector<4x8x32xbf16>
    %c0_6 = arith.constant 0 : index
    %c0_7 = arith.constant 0 : index
    %c0_8 = arith.constant 0 : index
    %9 = vector.load %arg5[%c0_6, %c0_7, %c0_8] : memref<1x8x128xf32, #tpu.memory_space<vmem>>, vector<1x8x128xf32>
    %10 = vector.shape_cast %9 : vector<1x8x128xf32> to vector<8x128xf32>
    %11 = arith.truncf %10 : vector<8x128xf32> to vector<8x128xbf16>
    %12 = vector.shape_cast %11 : vector<8x128xbf16> to vector<8x4x32xbf16>
    %13 = tpu.transpose %12, [1, 0, 2] : vector<8x4x32xbf16> -> vector<4x8x32xbf16>
    "tpu.trace_start"() <{level = 10 : i32, message = "hqe,hke->hqk"}> : () -> ()
    %cst = arith.constant dense<0.000000e+00> : vector<4x8x8xf32>
    %14 = tpu.matmul %3, %8, %cst {dimension_numbers = #tpu.dot_dimension_numbers<[2], [2], [1], [1], [0, 0, 0, 1, 1, 1], [0], [0]>} : vector<4x8x32xbf16>, vector<4x8x32xbf16>, vector<4x8x8xf32> -> vector<4x8x8xf32>
    "tpu.trace_stop"() : () -> ()
    %c0_9 = arith.constant 0 : index
    %c0_10 = arith.constant 0 : index
    %c0_11 = arith.constant 0 : index
    %15 = vector.load %arg8[%c0_9, %c0_10, %c0_11] : memref<4x8x1xf32, #tpu.memory_space<vmem>>, vector<4x8x1xf32>
    %cst_12 = arith.constant dense<0xFF800000> : vector<4x8xf32>
    %16 = vector.multi_reduction <maximumf>, %14, %cst_12 [2] : vector<4x8x8xf32> to vector<4x8xf32>
    %17 = vector.shape_cast %16 : vector<4x8xf32> to vector<4x8x1xf32>
    %18 = arith.maximumf %15, %17 : vector<4x8x1xf32>
    %19 = arith.subf %15, %18 : vector<4x8x1xf32>
    %20 = math.exp %19 : vector<4x8x1xf32>
    %21 = vector.broadcast %18 : vector<4x8x1xf32> to vector<4x8x8xf32>
    %22 = arith.subf %14, %21 : vector<4x8x8xf32>
    %23 = math.exp %22 : vector<4x8x8xf32>
    %c0_13 = arith.constant 0 : index
    %c0_14 = arith.constant 0 : index
    %c0_15 = arith.constant 0 : index
    %24 = vector.load %arg9[%c0_13, %c0_14, %c0_15] : memref<4x8x1xf32, #tpu.memory_space<vmem>>, vector<4x8x1xf32>
    %25 = arith.mulf %20, %24 : vector<4x8x1xf32>
    %cst_16 = arith.constant dense<0.000000e+00> : vector<4x8xf32>
    %26 = vector.multi_reduction <add>, %23, %cst_16 [2] : vector<4x8x8xf32> to vector<4x8xf32>
    %27 = vector.shape_cast %26 : vector<4x8xf32> to vector<4x8x1xf32>
    %28 = arith.addf %25, %27 : vector<4x8x1xf32>
    %c0_17 = arith.constant 0 : index
    %c0_18 = arith.constant 0 : index
    %c0_19 = arith.constant 0 : index
    %29 = vector.load %arg9[%c0_17, %c0_18, %c0_19] : memref<4x8x1xf32, #tpu.memory_space<vmem>>, vector<4x8x1xf32>
    tpu.vector_store %arg9[%c0_17, %c0_18, %c0_19], %28 {strides = array<i32>} : memref<4x8x1xf32, #tpu.memory_space<vmem>>, vector<4x8x1xf32>,
    %c0_20 = arith.constant 0 : index
    %c0_21 = arith.constant 0 : index
    %c0_22 = arith.constant 0 : index
    %30 = vector.load %arg10[%c0_20, %c0_21, %c0_22] : memref<4x8x32xf32, #tpu.memory_space<vmem>>, vector<4x8x32xf32>
    %31 = vector.broadcast %20 : vector<4x8x1xf32> to vector<4x8x32xf32>
    %32 = arith.mulf %31, %30 : vector<4x8x32xf32>
    %33 = arith.truncf %23 : vector<4x8x8xf32> to vector<4x8x8xbf16>
    "tpu.trace_start"() <{level = 10 : i32, message = "hqk,hke->hqe"}> : () -> ()
    %cst_23 = arith.constant dense<0.000000e+00> : vector<4x8x32xf32>
    %34 = tpu.matmul %33, %13, %cst_23 {dimension_numbers = #tpu.dot_dimension_numbers<[2], [1], [1], [2], [0, 0, 0, 1, 1, 2], [0], [0]>} : vector<4x8x8xbf16>, vector<4x8x32xbf16>, vector<4x8x32xf32> -> vector<4x8x32xf32>
    "tpu.trace_stop"() : () -> ()
    %35 = arith.addf %32, %34 : vector<4x8x32xf32>
    %c0_24 = arith.constant 0 : index
    %c0_25 = arith.constant 0 : index
    %c0_26 = arith.constant 0 : index
    %36 = vector.load %arg10[%c0_24, %c0_25, %c0_26] : memref<4x8x32xf32, #tpu.memory_space<vmem>>, vector<4x8x32xf32>
    tpu.vector_store %arg10[%c0_24, %c0_25, %c0_26], %35 {strides = array<i32>} : memref<4x8x32xf32, #tpu.memory_space<vmem>>, vector<4x8x32xf32>,
    %c0_27 = arith.constant 0 : index
    %c0_28 = arith.constant 0 : index
    %c0_29 = arith.constant 0 : index
    %37 = vector.load %arg8[%c0_27, %c0_28, %c0_29] : memref<4x8x1xf32, #tpu.memory_space<vmem>>, vector<4x8x1xf32>
    tpu.vector_store %arg8[%c0_27, %c0_28, %c0_29], %18 {strides = array<i32>} : memref<4x8x1xf32, #tpu.memory_space<vmem>>, vector<4x8x1xf32>,
    %c0_i32_30 = arith.constant 0 : i32
    %38 = arith.cmpi eq, %arg2, %c0_i32_30 : i32
    %39 = arith.extui %38 : i1 to i32
    %c0_i32_31 = arith.constant 0 : i32
    %40 = arith.cmpi ne, %39, %c0_i32_31 : i32
    scf.if %40 {
      %c0_32 = arith.constant 0 : index
      %c0_33 = arith.constant 0 : index
      %c0_34 = arith.constant 0 : index
      %41 = vector.load %arg9[%c0_32, %c0_33, %c0_34] : memref<4x8x1xf32, #tpu.memory_space<vmem>>, vector<4x8x1xf32>
      %42 = tpu.reciprocal %41 {approx = true} : vector<4x8x1xf32> -> vector<4x8x1xf32>
      %c0_35 = arith.constant 0 : index
      %c0_36 = arith.constant 0 : index
      %c0_37 = arith.constant 0 : index
      %43 = vector.load %arg10[%c0_35, %c0_36, %c0_37] : memref<4x8x32xf32, #tpu.memory_space<vmem>>, vector<4x8x32xf32>
      %44 = vector.broadcast %42 : vector<4x8x1xf32> to vector<4x8x32xf32>
      %45 = arith.mulf %43, %44 : vector<4x8x32xf32>
      %46 = tpu.transpose %45, [1, 0, 2] : vector<4x8x32xf32> -> vector<8x4x32xf32>
      %47 = vector.shape_cast %46 : vector<8x4x32xf32> to vector<8x128xf32>
      %c0_38 = arith.constant 0 : index
      %c0_39 = arith.constant 0 : index
      %c0_40 = arith.constant 0 : index
      %48 = vector.load %arg6[%c0_38, %c0_39, %c0_40] : memref<1x8x128xf32, #tpu.memory_space<vmem>>, vector<1x8x128xf32>
      %49 = vector.shape_cast %48 : vector<1x8x128xf32> to vector<8x128xf32>
      %50 = vector.shape_cast %47 : vector<8x128xf32> to vector<1x8x128xf32>
      tpu.vector_store %arg6[%c0_38, %c0_39, %c0_40], %50 {strides = array<i32>} : memref<1x8x128xf32, #tpu.memory_space<vmem>>, vector<1x8x128xf32>,
    } else {
    }
    return
  }
  func.func @transform_0(%arg0: i32, %arg1: i32, %arg2: i32) -> (i32, i32, i32) {
    %c0_i32 = arith.constant 0 : i32
    %c0_i32_0 = arith.constant 0 : i32
    return %arg0, %arg1, %c0_i32 : i32, i32, i32
  }
  func.func @transform_1(%arg0: i32, %arg1: i32, %arg2: i32) -> (i32, i32, i32) {
    %c0_i32 = arith.constant 0 : i32
    %c0_i32_0 = arith.constant 0 : i32
    return %arg0, %arg2, %c0_i32 : i32, i32, i32
  }
  func.func @transform_2(%arg0: i32, %arg1: i32, %arg2: i32) -> (i32, i32, i32) {
    %c0_i32 = arith.constant 0 : i32
    %c0_i32_0 = arith.constant 0 : i32
    return %arg0, %arg2, %c0_i32 : i32, i32, i32
  }
  func.func @transform_3(%arg0: i32, %arg1: i32, %arg2: i32) -> (i32, i32, i32) {
    %c0_i32 = arith.constant 0 : i32
    %c0_i32_0 = arith.constant 0 : i32
    return %arg0, %arg1, %c0_i32 : i32, i32, i32
  }
}

</mosaic_0001>

<bundles_post_ra>
// kernel: tpu_custom_call.1
= control target key start
LH: loop header
LB: loop body
LE: loop exit
PB: predicated region body
PF: predicated region fallthrough
CT: control target
= control target key end

     0   :  { %s2563_s0 = inlined_call_operand.hbm [shape: f32[2,8,128], index: 0, kind: input, shape index: {}]   ;;  %s2564_s1 = inlined_call_operand.hbm [shape: f32[2,8,128], index: 1, kind: input, shape index: {}]   ;;  %s2565_s2 = inlined_call_operand.hbm [shape: f32[2,8,128], index: 2, kind: input, shape index: {}]   ;;  %s2566_s3 = inlined_call_operand.hbm [shape: f32[2,8,128], index: 3, kind: output, shape index: {}]  }
   0x1   :  { %2572 = sst [smem:[#allocation19_spill]] %s2564_s1 }
   0x2   :  { %8 = vsyncpa [#allocation7], 0 }
   0x3   :  { %10 = vsyncpa [#allocation7 + $0x1], 0 }
   0x4   :  { %11 = vsyncpa [#allocation10], 0 }
   0x5   :  { %13 = vsyncpa [#allocation10 + $0x1], 0 }
   0x6   :  { %14 = vsyncpa [#allocation8], 0 }
   0x7   :  { %16 = vsyncpa [#allocation8 + $0x1], 0  ;;  %s2064_s12 = smov 0   ;;  %s2066_s13 = smov 0  }
   0x8   :  { %s2068_s14 = smov 0   ;;  %s2070_s15 = smov 0  }
   0x9   :  { %s2072_s16 = smov 0   ;;  %s2074_s17 = smov 0  }
   0xa LB: > { %2573 = sst [smem:[#allocation16_spill]] %s2025_s16  ;;  %s2095_s18 = sadd.s32 4294967295, %s2029_s17   ;;  %s2029_s17 = sphi %s2074_s17, %s22_s17   ;;  %s2025_s16 = sphi %s2072_s16, %s2594_s16   ;;  %s2021_s15 = sphi %s2070_s15, %s2593_s15   ;;  %s2017_s14 = sphi %s2068_s14, %s2597_s14   ;;  %s2013_s13 = sphi %s2066_s13, %s2596_s13   ;;  %s2009_s12 = sphi %s2064_s12, %s2595_s12  }
   0xb   : > { %s1652_s19 = sadd.s32 4294967294, %s2029_s17   ;;  %s41_s20 = sadd.s32 1, %s2025_s16 }
   0xc   : > { %s50_s21 = sadd.s32 1, %s2017_s14  ;;  %p43_p0 = scmp.ge.s32.totalorder %s41_s20, 2 }
   0xd   : > { %p57_p1 = scmp.ne.s32.totalorder %s2017_s14, %s2013_s13  ;;  %p58_p2 = scmp.eq.s32.totalorder %s2029_s17, 0 }
   0xe   : > { %p63_p3 = scmp.ne.s32.totalorder %s2013_s13, %s2009_s12  ;;  %s2599_s20 = smov (%p43_p0, %s41_s20), 0 }
   0xf   : > { %2574 = sst [smem:[#allocation17_spill]] %s2599_s20  ;;  %p2107_p4 = por %p58_p2, %p57_p1 }
  0x10   : > { %p64_p5 = scmp.eq.s32.totalorder %s2095_s18, 0  ;;  %s45_s23 = ssub.s32 %s2025_s16, %s2599_s20 }
  0x11   : > { %p145_p6 = scmp.eq.s32.totalorder %s2095_s18, 1  ;;  %p48_p7 = scmp.eq.s32.totalorder %s45_s23, 0 }
  0x12   : > { %p2115_p8 = por %p64_p5, %p63_p3  ;;  %p151_p10 = scmp.eq.s32.totalorder %s1652_s19, 1 }
  0x13   : > { %p2119_p9 = por %p145_p6, %p57_p1  ;;  %p1768_p13 = scmp.lt.s32.totalorder %s2029_s17, 2 }
  0x14   : > { %s2576_s24 = scalar_select %p2115_p8, 1, 0 }
  0x15   : > { %s2577_s25 = scalar_select %p2119_p9, 1, 0 }
  0x16   : > { %s2124_s26 = scalar_select %p48_p7, %s2017_s14, %s50_s21  }
  0x17   : > { %p2126_p11 = por %p151_p10, %p63_p3  ;;  %s171_s28 = sand.u32 1, %s2017_s14  }
  0x18   : > { %2578 = sst [smem:[#allocation18_spill]] %s2124_s26  ;;  %s2135_s29 = sshll.u32 %s171_s28, 3 }
  0x19   : > { %s2579_s27 = scalar_select %p2126_p11, 1, 0 }
  0x1a   : > { %s2138_s30 = sshll.u32 %s2025_s16, 7  ;;  %p2142_p0 = pnand %p1768_p13, %p2107_p4 }
  0x1b   : > { %s190_s5 = sand.u32 1, %s2029_s17   ;;  %s2581_s1 = sld [smem:[#allocation19_spill]] }
  0x1c   : > { %s2580_s4 = scalar_select %p2142_p0, 1, 0 }
  0x1d   : > { %s194_s9 = scalar_lea.vmem [#allocation9], %s2135_s29  ;;  %s2158_s11 = scalar_lea.sflag [#allocation10], %s190_s5 }
  0x1e   : > { %s202_s10 = sshll.u32 %s194_s9, 4  ;;  %p2164_p4 = pneg %p2142_p0  ;;  %s2155_s10 = int_to_ptr.vmem [resolvable:$true] %s202_s10 }
  0x21   : > { %s2151_s8 = scalar_lea.hbm %s2581_s1, %s2138_s30  ;;  %s1858_s6 = scalar_lea.hbm %s2581_s1, 256 }
  0x22   : > { %s1853_s19 = scalar_lea.hbm %s2151_s8, 128  ;;  %p1859_p7 = scmp.lt.u32.totalorder %s2151_s8, %s2581_s1 }
  0x23   : > { %p1854_p3 = scmp.ne.s32.totalorder %s2151_s8, %s1853_s19  ;;  %p1860_p10 = scmp.lt.u32.totalorder %s1858_s6, %s1853_s19 }
  0x24   : > { %p1862_p12 = scmp.lt.u32.totalorder %s1853_s19, %s2151_s8 }
  0x25   : > { %p1856_p5 = pnand %p2164_p4, %p1854_p3  ;;  %p1861_p13 = por %p1860_p10, %p1859_p7 }
  0x27   : > { %p1857_p6 = pneg %p1856_p5  ;;  %p1863_p1 = por %p1862_p12, %p1861_p13 }
  0x29   : > { %p1864_p2 = pnand %p1863_p1, %p1857_p6 }
  0x2b   : > { %1867 = shalt.err (!%p1864_p2)
}
  0x2c   : > { %s1868_s5 = scalar_lea.vmem %s2155_s10, 128  ;;  %s2031_s22 = smov [#allocation9]  }
  0x2d   : > { %p1869_p3 = scmp.ne.s32.totalorder %s2155_s10, %s1868_s5  ;;  %s1873_s23 = sshll.u32 %s2031_s22, 4  ;;  %s1874_s23 = int_to_ptr.vmem [resolvable:$false] %s1873_s23 }
  0x2e   : > { %s1875_s7 = scalar_lea.vmem %s1874_s23, 256  ;;  %p1876_p9 = scmp.lt.s32.totalorder %s2155_s10, %s1874_s23 }
  0x2f   : > { %p1871_p5 = pnand %p1869_p3, %p2164_p4  ;;  %p1877_p8 = scmp.lt.s32.totalorder %s1875_s7, %s1868_s5 }
  0x31   : > { %p1872_p11 = pneg %p1871_p5  ;;  %p1878_p7 = por %p1877_p8, %p1876_p9 }
  0x33   : > { %p1879_p10 = pnand %p1878_p7, %p1872_p11 }
  0x35   : > { %1882 = shalt.err (!%p1879_p10)
}
  0x36   : > { %1760 = dma.hbm_to_vmem [thread:$0]  (!%p2142_p0), %s2151_s8, 128, %s2155_s10, %s2158_s11  }
  0x37   : > { %p2583_p12 = scmp.lt.s32.totalorder %s2029_s17, 3  ;;  %p2584_p1 = scmp.ge.s32.totalorder %s2029_s17, 1 }
  0x38   : > { %s2200_s5 = scalar_lea.hbm %s2563_s0, %s2138_s30  ;;  %s175_s22 = scalar_lea.vmem [#allocation6], %s2135_s29 }
  0x39   : > { %p2192_p2 = pnand %p2584_p1, %p2583_p12  ;;  %s183_s23 = sshll.u32 %s175_s22, 4  ;;  %s2203_s23 = int_to_ptr.vmem [resolvable:$true] %s183_s23 }
  0x3a   : > { %s2209_s7 = scalar_lea.hbm %s2565_s2, %s2138_s30  ;;  %s172_s1 = scalar_lea.sflag [#allocation7], %s171_s28 }
  0x3b   : > { %s2585_s19 = scalar_select %p2192_p2, 1, 0 }
  0x3c   : > { %s1883_s20 = scalar_lea.hbm %s2200_s5, 128  ;;  %s1888_s16 = scalar_lea.hbm %s2563_s0, 256 }
  0x3d   : > { %p1884_p8 = scmp.ne.s32.totalorder %s2200_s5, %s1883_s20  ;;  %p1889_p6 = scmp.lt.u32.totalorder %s2200_s5, %s2563_s0 }
  0x3e   : > { %p1890_p13 = scmp.lt.u32.totalorder %s1888_s16, %s1883_s20  ;;  %p1892_p5 = scmp.lt.u32.totalorder %s1883_s20, %s2200_s5 }
  0x3f   : > { %p1886_p9 = pnand %p1884_p8, %p2164_p4 }
  0x40   : > { %p1891_p3 = por %p1890_p13, %p1889_p6 }
  0x41   : > { %p1887_p11 = pneg %p1886_p9 }
  0x42   : > { %p1893_p7 = por %p1892_p5, %p1891_p3 }
  0x44   : > { %p1894_p10 = pnand %p1893_p7, %p1887_p11 }
  0x46   : > { %1897 = shalt.err (!%p1894_p10)
}
  0x47   : > { %s1898_s28 = scalar_lea.vmem %s2203_s23, 128  ;;  %s2032_s30 = smov [#allocation6]  }
  0x48   : > { %p1899_p12 = scmp.ne.s32.totalorder %s2203_s23, %s1898_s28  ;;  %s1903_s8 = sshll.u32 %s2032_s30, 4  ;;  %s1904_s8 = int_to_ptr.vmem [resolvable:$false] %s1903_s8 }
  0x49   : > { %s1905_s26 = scalar_lea.vmem %s1904_s8, 256  ;;  %p1906_p9 = scmp.lt.s32.totalorder %s2203_s23, %s1904_s8 }
  0x4a   : > { %p1901_p1 = pnand %p1899_p12, %p2164_p4  ;;  %p1907_p2 = scmp.lt.s32.totalorder %s1905_s26, %s1898_s28 }
  0x4c   : > { %p1902_p8 = pneg %p1901_p1  ;;  %p1908_p6 = por %p1907_p2, %p1906_p9 }
  0x4e   : > { %p1909_p13 = pnand %p1908_p6, %p1902_p8 }
  0x50   : > { %1912 = shalt.err (!%p1909_p13)
}
  0x51   : > { %1757 = dma.hbm_to_vmem [thread:$0]  (!%p2142_p0), %s2200_s5, 128, %s2203_s23, %s172_s1  }
  0x52   : > { %s213_s16 = scalar_lea.vmem [#allocation11], %s2135_s29  ;;  %s1913_s10 = scalar_lea.hbm %s2209_s7, 128 }
  0x53   : > { %s221_s20 = sshll.u32 %s213_s16, 4  ;;  %p1914_p11 = scmp.ne.s32.totalorder %s2209_s7, %s1913_s10  ;;  %s222_s20 = int_to_ptr.vmem [resolvable:$true] %s221_s20 }
  0x54   : > { %s1918_s22 = scalar_lea.hbm %s2565_s2, 256  ;;  %p1919_p5 = scmp.lt.u32.totalorder %s2209_s7, %s2565_s2 }
  0x55   : > { %p1916_p2 = pnand %p1914_p11, %p2164_p4  ;;  %p1920_p7 = scmp.lt.u32.totalorder %s1918_s22, %s1913_s10 }
  0x56   : > { %p1922_p12 = scmp.lt.u32.totalorder %s1913_s10, %s2209_s7 }
  0x57   : > { %p1917_p3 = pneg %p1916_p2  ;;  %p1921_p10 = por %p1920_p7, %p1919_p5 }
  0x59   : > { %p1923_p1 = por %p1922_p12, %p1921_p10 }
  0x5b   : > { %p1924_p8 = pnand %p1923_p1, %p1917_p3 }
  0x5d   : > { %1927 = shalt.err (!%p1924_p8)
}
  0x5e   : > { %s1928_s1 = scalar_lea.vmem %s222_s20, 128  ;;  %s2033_s29 = smov [#allocation11]  }
  0x5f   : > { %p1929_p9 = scmp.ne.s32.totalorder %s222_s20, %s1928_s1  ;;  %s1933_s5 = sshll.u32 %s2033_s29, 4  ;;  %s1934_s5 = int_to_ptr.vmem [resolvable:$false] %s1933_s5 }
  0x60   : > { %s1935_s23 = scalar_lea.vmem %s1934_s5, 256  ;;  %p1936_p11 = scmp.lt.s32.totalorder %s222_s20, %s1934_s5 }
  0x61   : > { %p1931_p6 = pnand %p1929_p9, %p2164_p4  ;;  %p1937_p2 = scmp.lt.s32.totalorder %s1935_s23, %s1928_s1 }
  0x63   : > { %p1932_p13 = pneg %p1931_p6  ;;  %p1938_p0 = por %p1937_p2, %p1936_p11 }
  0x65   : > { %p1939_p5 = pnand %p1938_p0, %p1932_p13 }
  0x67   : > { %1942 = shalt.err (!%p1939_p5)
}
  0x68   : > { %p2586_p7 = scmp.ne.s32.totalorder %s2580_s4, 0  ;;  %p2587_p3 = scmp.ne.s32.totalorder %s2585_s19, 0 }
  0x69   : > { %s2256_s21 = sand.u32 (!%p2587_p3), 1, %s2013_s13   ;;  %p2588_p0 = scmp.ne.s32.totalorder (!%p2587_p3), %s2576_s24, 0 }
  0x6a   : > { %1763 = dma.hbm_to_vmem [thread:$0]  (!%p2586_p7), %s2209_s7, 128, %s222_s20, %s2158_s11  }
  0x6b   : > { %230 = sbr.rel (%p2587_p3) target bundleno = 1233 (0x4d1), region = 32  ;;  %s2259_s8 = sshll.u32 (!%p2587_p3), %s2256_s21, 3 }
  0x6c   : > { %s233_s26 = scalar_lea.sflag (!%p2587_p3), [#allocation7], %s2256_s21  ;;  %s236_s16 = scalar_lea.vmem (!%p2587_p3), [#allocation6], %s2259_s8 }
  0x72   : > { %1996 = dma.done.wait (%p2588_p0), %s233_s26, 128  }
  0x73   : > { %1998 = vsyncadd (%p2588_p0), %s233_s26, 4294967168  ;;  %s241_s4 = sand.u32 1, %s2095_s18   ;;  %s245_s19 = scalar_lea.vmem [#allocation9], %s2259_s8 }
  0x74   : > { %s242_s11 = scalar_lea.sflag [#allocation10], %s241_s4 }
  0x75   : > { %2000 = dma.done.wait (%p2588_p0), %s242_s11, 256  }
  0x76   : > { %2002 = vsyncadd (%p2588_p0), %s242_s11, 4294967040  ;;  %v2034_v0 = vmov 0   ;;  %v467_v1 = vld [vmem:[%s245_s19] sm:$0xff]  ;;  %v306_v2 = vld [vmem:[%s236_s16] sm:$0xff]  ;;  %s2035_s7 = smov 32   ;;  %s2036_s20 = smov 96   ;;  %v323_v8 = vlaneseq }
  0x77   : > { %1828 = vset.pattern.permute.xlu0 %v2034_v0  ;;  %1827 = vset.pattern.permute.xlu1 %v2034_v0  ;;  %v468_v3 = vpack.c.bf16 %v467_v1, %v467_v1  ;;  %v307_v4 = vmul.f32 0.17677669, %v306_v2  ;;  %s2037_s18 = smov 64   ;;  %vm301_vm0 = vcmask 261120   ;;  %v2038_v5 = vmov 0.0   ;;  %s254_s24 = scalar_lea.vmem [#allocation11], %s2259_s8 }
  0x78   : > { %1698 = vmatprep.subr.bf16.mxu0 %v2038_v5  ;;  %302 = vst.msk [vmem:[#allocation5] sm:$0xff] %vm301_vm0, %v2038_v5  ;;  %303 = vst.msk [vmem:[#allocation5 + $0x8] sm:$0xff] %vm301_vm0, %v2038_v5  ;;  %1704 = vmatprep.subr.bf16.mxu1 %v2038_v5  ;;  %vm2039_vm1 = vmmov 0   ;;  %v2040_v6 = vmov 1983009808   ;;  %v324_v10 = vshrl.u32 %v323_v8, 7 }
  0x79   : > { %474 = vrot.lane.b32.xlu1 %v468_v3, %s2035_s7  ;;  %470 = vrot.lane.b32.xlu0 %v468_v3, %s2036_s20  ;;  %304 = vst.msk [vmem:[#allocation5 + $0x10] sm:$0xff] %vm301_vm0, %v2038_v5  ;;  %305 = vst.msk [vmem:[#allocation5 + $0x18] sm:$0xff] %vm301_vm0, %v2038_v5  ;;  %v321_v7 = vunpack.c.l.s4 %v2040_v6  ;;  %v2041_v11 = vmov 1934713408   ;;  %vm458_vm2 = vcmask 257024   ;;  %vm292_vm3 = vcmask 7168  }
  0x7a   : > { %1700 = vmatprep.mubr.msk.bf16.mxu0 %vm2039_vm1, %v2038_v5  ;;  %1706 = vmatprep.mubr.msk.bf16.mxu1 %vm2039_vm1, %v2038_v5  ;;  %v353_v12 = vunpack.c.l.s4 %v2041_v11  ;;  %297 = vst.msk [vmem:[#allocation4] sm:$0xff] %vm292_vm3, %v2038_v5  ;;  %298 = vst.msk [vmem:[#allocation4 + $0x8] sm:$0xff] %vm292_vm3, %v2038_v5  ;;  %vm996_vm4 = vcmask 64512   ;;  %vm1121_vm5 = vcmask 1043456   ;;  %vm1503_vm6 = vcmask 523264   ;;  %s1679_s10 = sshll.u32 %s2021_s15, 7 }
  0x7b   : > { %v322_v9 = vunpack.c.0.s8 %v321_v7  ;;  %299 = vst.msk [vmem:[#allocation4 + $0x10] sm:$0xff] %vm292_vm3, %v2038_v5  ;;  %300 = vst.msk [vmem:[#allocation4 + $0x18] sm:$0xff] %vm292_vm3, %v2038_v5  ;;  %s286_s6 = scalar_lea.vmem [#allocation12], %s2259_s8  ;;  %vm1505_vm7 = vcmask 785408   ;;  %s2514_s30 = scalar_lea.hbm %s2566_s3, %s1679_s10 }
  0x7c   : > { %v354_v14 = vunpack.c.0.s8 %v353_v12  ;;  %s1523_s9 = sshll.u32 %s286_s6, 4  ;;  %s1509_s1 = scalar_lea.sflag [#allocation8], %s2256_s21  ;;  %s2516_s9 = int_to_ptr.vmem [resolvable:$true] %s1523_s9 }
  0x7d   : > { %472 = vrot.lane.b32.xlu0 %v468_v3, %s2037_s18  ;;  %309 = vrot.lane.b32.xlu1 %v307_v4, %s2036_s20  ;;  %v2295_v13 = vsub.s32 %v322_v9, %v324_v10  ;;  %s1943_s29 = scalar_lea.vmem %s2516_s9, 128  ;;  %p2589_p10 = scmp.ne.s32.totalorder %s2577_s25, 0 }
  0x7e   : > { %v2298_v18 = vsub.s32 %v354_v14, %v324_v10  ;;  %p1944_p4 = scmp.ne.s32.totalorder %s2516_s9, %s1943_s29  ;;  %s2043_s15 = smov [#allocation12]  }
  0x7f   : > { %v482_v23 = vrot.slane %v468_v3, %v2295_v13  ;;  %s1947_s5 = sshll.u32 %s2043_s15, 4  ;;  %s1948_s5 = int_to_ptr.vmem [resolvable:$false] %s1947_s5 }
  0x80   : > { %p1945_p12 = pnand %p1944_p4, %p2589_p10  ;;  %s1949_s23 = scalar_lea.vmem %s1948_s5, 256 }
  0x81   : > { %312 = vrot.lane.b32.xlu0 %v307_v4, %s2037_s18  ;;  %315 = vrot.lane.b32.xlu1 %v307_v4, %s2035_s7  ;;  %p1950_p8 = scmp.lt.s32.totalorder %s2516_s9, %s1948_s5  ;;  %p1951_p9 = scmp.lt.s32.totalorder %s1949_s23, %s1943_s29 }
  0x82   : > { %p1946_p1 = pneg %p1945_p12 }
  0x83   : > { %p1952_p6 = por %p1951_p9, %p1950_p8 }
  0x85   : > { %p1953_p13 = pnand %p1952_p6, %p1946_p1 }
  0xeb   : > { %v475_v15 = vpop.permute.xlu1 %474  ;;  %v471_v16 = vpop.permute.xlu0 %470 }
  0xec   : > { %v524_v17 = vrot.slane %v475_v15, %v2295_v13  ;;  %v516_v19 = vrot.slane %v471_v16, %v2295_v13 }
  0xee   : > { %v525_v20 = vcombine.low %v516_v19, %v524_v17  ;;  %v526_v21 = vcombine.high %v516_v19, %v524_v17 }
  0xef   : > { %v473_v22 = vpop.permute.xlu0 %472  ;;  %v310_v24 = vpop.permute.xlu1 %309 }
  0xf0   : > { %v533_v25 = vrot.slane %v525_v20, %v2298_v18  ;;  %v540_v26 = vrot.slane %v526_v21, %v2298_v18  ;;  %v490_v27 = vrot.slane %v473_v22, %v2295_v13 }
  0xf2   : > { %v541_v28 = vcombine.high %v533_v25, %v2034_v0  ;;  %v542_v29 = vcombine.high %v540_v26, %v2034_v0  ;;  %v491_v30 = vcombine.low %v482_v23, %v490_v27  ;;  %v492_v31 = vcombine.high %v482_v23, %v490_v27 }
  0xf3   : > { %v313_v32 = vpop.permute.xlu0 %312  ;;  %v316_v33 = vpop.permute.xlu1 %315  ;;  %v548_v34 = vshrl.u32 %v533_v25, 16  ;;  %v564_v35 = vshrl.u32 %v540_v26, 16 }
  0xf4   : > { %v318_v36 = vcombine.low %v307_v4, %v313_v32  ;;  %v319_v37 = vcombine.high %v307_v4, %v313_v32  ;;  %v499_v38 = vrot.slane %v491_v30, %v2298_v18  ;;  %v506_v39 = vrot.slane %v492_v31, %v2298_v18 }
  0xf5   : > { %v334_v40 = vcombine.low %v310_v24, %v316_v33  ;;  %v335_v41 = vcombine.high %v310_v24, %v316_v33  ;;  %v556_v42 = vshrl.u32 %v541_v28, 16  ;;  %v572_v43 = vshrl.u32 %v542_v29, 16 }
  0xf6   : > { %v326_v44 = vrot.slane %v318_v36, %v2295_v13  ;;  %v333_v45 = vrot.slane %v319_v37, %v2295_v13  ;;  %v507_v46 = vcombine.high %v499_v38, %v2034_v0  ;;  %v508_v47 = vcombine.high %v506_v39, %v2034_v0 }
  0xf7   : > { %v545_v48 = vpack.i.b16 %v533_v25, %v499_v38  ;;  %v547_v49 = vshrl.u32 %v499_v38, 16  ;;  %v561_v50 = vpack.i.b16 %v540_v26, %v506_v39  ;;  %v563_v51 = vshrl.u32 %v506_v39, 16 }
  0xf8   : > { %v342_v52 = vrot.slane %v334_v40, %v2295_v13  ;;  %v349_v53 = vrot.slane %v335_v41, %v2295_v13  ;;  %v553_v55 = vpack.i.b16 %v541_v28, %v507_v46  ;;  %v555_v56 = vshrl.u32 %v507_v46, 16 }
  0xf9   : > { %v549_v54 = vpack.i.b16 %v548_v34, %v547_v49  ;;  %v569_v57 = vpack.i.b16 %v542_v29, %v508_v47  ;;  %v565_v58 = vpack.i.b16 %v564_v35, %v563_v51  ;;  %v571_v59 = vshrl.u32 %v508_v47, 16 }
  0xfa   : > { %v575_v60 = vcombine.low %v545_v48, %v561_v50  ;;  %v350_v61 = vcombine.low %v326_v44, %v342_v52  ;;  %v557_v62 = vpack.i.b16 %v556_v42, %v555_v56  ;;  %v351_v63 = vcombine.high %v326_v44, %v342_v52 }
  0xfb   : > { %v366_v1 = vcombine.low %v333_v45, %v349_v53  ;;  %v367_v2 = vcombine.high %v333_v45, %v349_v53  ;;  %v573_v3 = vpack.i.b16 %v572_v43, %v571_v59  ;;  %v583_v6 = vcombine.low %v553_v55, %v569_v57 }
  0xfc   : > { %v358_v4 = vrot.slane %v350_v61, %v2298_v18  ;;  %v365_v7 = vrot.slane %v351_v63, %v2298_v18  ;;  %v600_v10 = vcombine.low %v549_v54, %v565_v58  ;;  %v582_v11 = vrot.slane %v575_v60, %v2295_v13 }
  0xfd   : > { %v374_v8 = vrot.slane %v366_v1, %v2298_v18  ;;  %v381_v9 = vrot.slane %v367_v2, %v2298_v18  ;;  %v590_v12 = vrot.slane %v583_v6, %v2295_v13  ;;  %v608_v14 = vcombine.low %v557_v62, %v573_v3 }
  0xfe   : > { %v386_v15 = vcombine.low %v358_v4, %v365_v7  ;;  %v1666_v16 = vcombine.high %v358_v4, %v365_v7  ;;  %v607_v21 = vrot.slane %v600_v10, %v2295_v13  ;;  %v2042_v1 = vmov -1e+30  }
  0xff   : > { %v402_v17 = vcombine.low %v374_v8, %v381_v9  ;;  %v1667_v19 = vcombine.high %v374_v8, %v381_v9  ;;  %v591_v20 = vcombine.low %v582_v11, %v590_v12  ;;  %v615_v22 = vrot.slane %v608_v14, %v2295_v13  ;;  %294 = vst.msk [vmem:[#allocation3 + $0x8] sm:$0xff] %vm292_vm3, %v2042_v1 }
 0x100   : > { %v393_v23 = vrot.slane %v386_v15, %v2295_v13  ;;  %v401_v24 = vrot.slane %v1666_v16, %v2295_v13  ;;  %293 = vst.msk [vmem:[#allocation3] sm:$0xff] %vm292_vm3, %v2042_v1  ;;  %295 = vst.msk [vmem:[#allocation3 + $0x10] sm:$0xff] %vm292_vm3, %v2042_v1 }
 0x101   : > { %v409_v25 = vrot.slane %v402_v17, %v2295_v13  ;;  %v417_v26 = vrot.slane %v1667_v19, %v2295_v13  ;;  %v598_v27 = vrot.slane %v591_v20, %v2298_v18  ;;  %v616_v28 = vcombine.low %v607_v21, %v615_v22  ;;  %296 = vst.msk [vmem:[#allocation3 + $0x18] sm:$0xff] %vm292_vm3, %v2042_v1 }
 0x102   : > { %v418_v29 = vcombine.low %v393_v23, %v401_v24  ;;  %v419_v30 = vcombine.high %v393_v23, %v401_v24  ;;  %v637_v24 = vld [vmem:[%s254_s24] sm:$0xff] }
 0x103   : > { %v434_v31 = vcombine.low %v409_v25, %v417_v26  ;;  %v435_v32 = vcombine.high %v409_v25, %v417_v26  ;;  %v623_v33 = vrot.slane %v616_v28, %v2298_v18  ;;  %v628_v39 = vshrl.u32 %v598_v27, 16 }
 0x104   : > { %v426_v34 = vrot.slane %v418_v29, %v2298_v18  ;;  %v433_v35 = vrot.slane %v419_v30, %v2298_v18  ;;  %v599_v48 = vcombine.high %v598_v27, %v2034_v0  ;;  %v638_v26 = vpack.c.bf16 %v637_v24, %v637_v24 }
 0x105   : > { %v442_v36 = vrot.slane %v434_v31, %v2298_v18  ;;  %v449_v37 = vrot.slane %v435_v32, %v2298_v18  ;;  %v627_v38 = vpack.i.b16 %v623_v33, %v598_v27  ;;  %v629_v40 = vshrl.u32 %v623_v33, 16 }
 0x106   : > { %v624_v41 = vcombine.high %v623_v33, %v2034_v0  ;;  %v634_v55 = vshrl.u32 %v599_v48, 16  ;;  %v2387_v27 = vld [vmem:[#allocation3 + $0x8] sm:$0xff] }
 0x107   : > { %v450_v42 = vcombine.low %v426_v34, %v442_v36  ;;  %v451_v43 = vcombine.high %v426_v34, %v442_v36  ;;  %v452_v44 = vcombine.low %v433_v35, %v449_v37  ;;  %v453_v45 = vcombine.high %v433_v35, %v449_v37  ;;  %v2389_v28 = vld [vmem:[#allocation3] sm:$0xff]  ;;  %v2407_v36 = vld [vmem:[#allocation3 + $0x10] sm:$0xff] }
 0x108   : > { %v812_v46 = vsel %vm301_vm0, %v627_v38, 0  ;;  %v630_v47 = vpack.i.b16 %v629_v40, %v628_v39  ;;  %v635_v54 = vshrl.u32 %v624_v41, 16  ;;  %v633_v56 = vpack.i.b16 %v624_v41, %v599_v48 }
 0x109   : > { %v454_v49 = vpack.c.bf16 %v450_v42, %v450_v42  ;;  %v455_v50 = vpack.c.bf16 %v451_v43, %v451_v43  ;;  %v456_v51 = vpack.c.bf16 %v452_v44, %v452_v44  ;;  %v457_v52 = vpack.c.bf16 %v453_v45, %v453_v45  ;;  %1699 = vmatpush3.bf16.xpose.msra.mxu0 %v812_v46  ;;  %v2414_v42 = vld [vmem:[#allocation3 + $0x18] sm:$0xff] }
 0x10a   : > { %v858_v53 = vsel %vm301_vm0, %v630_v47, 0  ;;  %1710 = vmatprep.subr.bf16.mxu0 %v2038_v5  ;;  %v636_v57 = vpack.i.b16 %v635_v54, %v634_v55  ;;  %v904_v60 = vsel %vm301_vm0, %v633_v56, 0 }
 0x10b   : > { %459 = vst.msk [vmem:[#allocation2] sm:$0xf] %vm458_vm2, %v454_v49  ;;  %460 = vst.msk [vmem:[#allocation2 + $0x4] sm:$0xf] %vm458_vm2, %v455_v50  ;;  %1705 = vmatpush3.bf16.xpose.msra.mxu1 %v858_v53  ;;  %v652_v50 = vrot.slane %v638_v26, %v2295_v13 }
 0x10c   : > { %461 = vst.msk [vmem:[#allocation2 + $0x8] sm:$0xf] %vm458_vm2, %v456_v51  ;;  %462 = vst.msk [vmem:[#allocation2 + $0xc] sm:$0xf] %vm458_vm2, %v457_v52  ;;  %1716 = vmatprep.subr.bf16.mxu1 %v2038_v5  ;;  %v950_v61 = vsel %vm301_vm0, %v636_v57, 0 }
 0x112   : > { %v463_v58 = vld [vmem:[#allocation2] sm:$0xf]  ;;  %v464_v59 = vld [vmem:[#allocation2 + $0x4] sm:$0xf] }
 0x113   : > { %1701 = vmatmul.mubr.msk.bf16.vlgmr.msra.gmra.mrb[0].mxu0 %vm301_vm0, %v463_v58  ;;  %1707 = vmatmul.mubr.msk.bf16.vlgmr.msra.gmra.mrb[0].mxu1 %vm301_vm0, %v464_v59  ;;  %v465_v62 = vld [vmem:[#allocation2 + $0x8] sm:$0xf]  ;;  %v466_v63 = vld [vmem:[#allocation2 + $0xc] sm:$0xf] }
 0x114   : > { %1711 = vmatpush3.bf16.xpose.msra.mxu0 %v904_v60  ;;  %1717 = vmatpush3.bf16.xpose.msra.mxu1 %v950_v61 }
 0x115   : > { %1712 = vmatprep.mubr.msk.bf16.mxu0 %vm2039_vm1, %v2038_v5  ;;  %1718 = vmatprep.mubr.msk.bf16.mxu1 %vm2039_vm1, %v2038_v5 }
 0x116   : > { %1722 = vmatprep.subr.bf16.mxu0 %v2038_v5  ;;  %1728 = vmatprep.subr.bf16.mxu1 %v2038_v5 }
 0x11b   : > { %1713 = vmatmul.mubr.msk.bf16.vlgmr.msra.gmra.mrb[4].mxu0 %vm301_vm0, %v465_v62  ;;  %1719 = vmatmul.mubr.msk.bf16.vlgmr.msra.gmra.mrb[4].mxu1 %vm301_vm0, %v466_v63 }
 0x11c   : > { %1724 = vmatprep.mubr.msk.bf16.mxu0 %vm2039_vm1, %v2038_v5  ;;  %1730 = vmatprep.mubr.msk.bf16.mxu1 %vm2039_vm1, %v2038_v5 }
 0x1e6   : > { %v2367_v2 = vpop.f32.mrb[0].mxu0  ;;  %v2369_v3 = vpop.f32.mrb[0].mxu1 }
 0x1e7   : > { %v1702_v4 = vpop.f32.mrb[1].mxu0  ;;  %v1708_v6 = vpop.f32.mrb[1].mxu1  ;;  %v1000_v7 = vsel %vm996_vm4, %v2369_v3, -inf  ;;  %v997_v8 = vsel %vm996_vm4, %v2367_v2, -inf }
 0x1e8   : > { %1001 = vmax.xlane.f32.xlu1 %v1000_v7  ;;  %v897_v9 = vpop.f32.mrb[2].mxu1  ;;  %998 = vmax.xlane.f32.xlu0 %v997_v8  ;;  %v851_v10 = vpop.f32.mrb[2].mxu0 }
 0x1e9   : > { %v1703_v11 = vpop.f32.mrb[3].mxu0  ;;  %v1709_v12 = vpop.f32.mrb[3].mxu1 }
 0x1ee   : > { %v2375_v14 = vpop.f32.mrb[4].mxu0  ;;  %v2377_v15 = vpop.f32.mrb[4].mxu1 }
 0x1ef   : > { %v1714_v16 = vpop.f32.mrb[5].mxu0  ;;  %v1720_v17 = vpop.f32.mrb[5].mxu1  ;;  %v1003_v19 = vsel %vm996_vm4, %v2375_v14, -inf  ;;  %v1006_v25 = vsel %vm996_vm4, %v2377_v15, -inf }
 0x1f0   : > { %v989_v20 = vpop.f32.mrb[6].mxu1  ;;  %1004 = vmax.xlane.f32.xlu0 %v1003_v19  ;;  %v943_v21 = vpop.f32.mrb[6].mxu0 }
 0x1f1   : > { %v1715_v22 = vpop.f32.mrb[7].mxu0  ;;  %v1721_v23 = vpop.f32.mrb[7].mxu1 }
 0x1f4   : > { %1007 = vmax.xlane.f32.xlu0 %v1006_v25 }
 0x1f9   : > { %640 = vrot.lane.b32.xlu1 %v638_v26, %s2036_s20 }
 0x1fd   : > { %644 = vrot.lane.b32.xlu1 %v638_v26, %s2035_s7 }
 0x20a   : > { %642 = vrot.lane.b32.xlu0 %v638_v26, %s2037_s18 }
 0x275   : > { %v1002_v29 = vpop.xlane.xlu1 %1001  ;;  %v999_v30 = vpop.xlane.xlu0 %998 }
 0x276   : > { %v2392_v31 = vmax.f32 %v2387_v27, %v1002_v29  ;;  %v2395_v32 = vmax.f32 %v2389_v28, %v999_v30 }
 0x278   : > { %v1014_v33 = vsub.f32 %v2387_v27, %v2392_v31  ;;  %1312 = vst.msk [vmem:[#allocation3 + $0x8] sm:$0xff] %vm292_vm3, %v2392_v31  ;;  %v1013_v34 = vsub.f32 %v2389_v28, %v2395_v32  ;;  %1311 = vst.msk [vmem:[#allocation3] sm:$0xff] %vm292_vm3, %v2395_v32  ;;  %1032 = vperm.xlu0 %1828, %v2392_v31   ;;  %1027 = vperm.xlu1 %1827, %v2395_v32   ;;  %v1059_v27 = vld [vmem:[#allocation4 + $0x10] sm:$0xff] }
 0x279   : > { %v641_v35 = vpop.permute.xlu1 %640 }
 0x27a   : > { %v686_v37 = vrot.slane %v641_v35, %v2295_v13 }
 0x27d   : > { %v1005_v38 = vpop.xlane.xlu0 %1004  ;;  %v645_v39 = vpop.permute.xlu1 %644 }
 0x27e   : > { %v2411_v40 = vmax.f32 %v2407_v36, %v1005_v38  ;;  %v694_v41 = vrot.slane %v645_v39, %v2295_v13 }
 0x280   : > { %v1015_v43 = vsub.f32 %v2407_v36, %v2411_v40  ;;  %1313 = vst.msk [vmem:[#allocation3 + $0x10] sm:$0xff] %vm292_vm3, %v2411_v40  ;;  %1037 = vperm.xlu1 %1827, %v2411_v40   ;;  %v695_v44 = vcombine.low %v686_v37, %v694_v41  ;;  %v696_v46 = vcombine.high %v686_v37, %v694_v41  ;;  %v1019_v40 = vmul.f32 1.442695, %v1014_v33 }
 0x281   : > { %v1008_v45 = vpop.xlane.xlu0 %1007 }
 0x282   : > { %v2422_v47 = vmax.f32 %v2414_v42, %v1008_v45  ;;  %v703_v48 = vrot.slane %v695_v44, %v2298_v18  ;;  %v710_v51 = vrot.slane %v696_v46, %v2298_v18 }
 0x284   : > { %v1016_v49 = vsub.f32 %v2414_v42, %v2422_v47  ;;  %1314 = vst.msk [vmem:[#allocation3 + $0x18] sm:$0xff] %vm292_vm3, %v2422_v47  ;;  %1042 = vperm.xlu1 %1827, %v2422_v47   ;;  %v711_v54 = vcombine.high %v703_v48, %v2034_v0  ;;  %v712_v57 = vcombine.high %v710_v51, %v2034_v0  ;;  %v718_v58 = vshrl.u32 %v703_v48, 16 }
 0x285   : > { %v643_v52 = vpop.permute.xlu0 %642  ;;  %v734_v62 = vshrl.u32 %v710_v51, 16 }
 0x286   : > { %v660_v53 = vrot.slane %v643_v52, %v2295_v13  ;;  %v726_v61 = vshrl.u32 %v711_v54, 16  ;;  %v742_v7 = vshrl.u32 %v712_v57, 16 }
 0x288   : > { %v661_v55 = vcombine.low %v652_v50, %v660_v53  ;;  %v662_v56 = vcombine.high %v652_v50, %v660_v53 }
 0x28a   : > { %v669_v59 = vrot.slane %v661_v55, %v2298_v18  ;;  %v676_v60 = vrot.slane %v662_v56, %v2298_v18 }
 0x28c   : > { %v677_v63 = vcombine.high %v669_v59, %v2034_v0  ;;  %v678_v1 = vcombine.high %v676_v60, %v2034_v0  ;;  %v715_v4 = vpack.i.b16 %v703_v48, %v669_v59  ;;  %v717_v6 = vshrl.u32 %v669_v59, 16 }
 0x28d   : > { %v731_v8 = vpack.i.b16 %v710_v51, %v676_v60  ;;  %v733_v9 = vshrl.u32 %v676_v60, 16 }
 0x28e   : > { %v719_v10 = vpack.i.b16 %v718_v58, %v717_v6  ;;  %v723_v11 = vpack.i.b16 %v711_v54, %v677_v63  ;;  %v725_v12 = vshrl.u32 %v677_v63, 16  ;;  %v739_v16 = vpack.i.b16 %v712_v57, %v678_v1 }
 0x28f   : > { %v735_v17 = vpack.i.b16 %v734_v62, %v733_v9  ;;  %v741_v19 = vshrl.u32 %v678_v1, 16  ;;  %v745_v20 = vcombine.low %v715_v4, %v731_v8 }
 0x290   : > { %v727_v21 = vpack.i.b16 %v726_v61, %v725_v12  ;;  %v753_v22 = vcombine.low %v723_v11, %v739_v16 }
 0x291   : > { %v743_v23 = vpack.i.b16 %v742_v7, %v741_v19  ;;  %v752_v24 = vrot.slane %v745_v20, %v2295_v13  ;;  %v770_v25 = vcombine.low %v719_v10, %v735_v17  ;;  %v1021_v19 = vmul.f32 1.442695, %v1015_v43 }
 0x292   : > { %v760_v26 = vrot.slane %v753_v22, %v2295_v13  ;;  %v1057_v22 = vld [vmem:[#allocation4] sm:$0xff] }
 0x293   : > { %v778_v29 = vcombine.low %v727_v21, %v743_v23  ;;  %v777_v30 = vrot.slane %v770_v25, %v2295_v13 }
 0x294   : > { %v761_v35 = vcombine.low %v752_v24, %v760_v26 }
 0x295   : > { %v785_v37 = vrot.slane %v778_v29, %v2295_v13 }
 0x296   : > { %v768_v38 = vrot.slane %v761_v35, %v2298_v18  ;;  %v1060_v35 = vld [vmem:[#allocation4 + $0x18] sm:$0xff] }
 0x297   : > { %v786_v39 = vcombine.low %v777_v30, %v785_v37 }
 0x298   : > { %v769_v41 = vcombine.high %v768_v38, %v2034_v0  ;;  %v798_v45 = vshrl.u32 %v768_v38, 16 }
 0x299   : > { %v793_v44 = vrot.slane %v786_v39, %v2298_v18 }
 0x29a   : > { %v804_v51 = vshrl.u32 %v769_v41, 16 }
 0x29b   : > { %v797_v46 = vpack.i.b16 %v793_v44, %v768_v38  ;;  %v799_v48 = vshrl.u32 %v793_v44, 16  ;;  %v794_v50 = vcombine.high %v793_v44, %v2034_v0 }
 0x29d   : > { %v1123_v52 = vsel %vm1121_vm5, %v797_v46, 0  ;;  %v800_v53 = vpack.i.b16 %v799_v48, %v798_v45  ;;  %v803_v54 = vpack.i.b16 %v794_v50, %v769_v41  ;;  %v805_v55 = vshrl.u32 %v794_v50, 16 }
 0x29e   : > { %1723 = vmatpush3.bf16.msra.mxu0 %v1123_v52 }
 0x29f   : > { %v1169_v56 = vsel %vm1121_vm5, %v800_v53, 0  ;;  %1734 = vmatprep.subr.bf16.mxu0 %v2038_v5  ;;  %v1215_v57 = vsel %vm1121_vm5, %v803_v54, 0  ;;  %v806_v58 = vpack.i.b16 %v805_v55, %v804_v51  ;;  %v1087_v55 = vld [vmem:[#allocation5 + $0x8] sm:$0xff] }
 0x2a0   : > { %1729 = vmatpush3.bf16.msra.mxu1 %v1169_v56 }
 0x2a1   : > { %1740 = vmatprep.subr.bf16.mxu1 %v2038_v5  ;;  %v1261_v59 = vsel %vm1121_vm5, %v806_v58, 0 }
 0x2f7   : > { %v1033_v0 = vpop.permute.xlu0 %1032  ;;  %v1028_v60 = vpop.permute.xlu1 %1027 }
 0x2f8   : > { %v1046_v61 = vsub.f32 %v2369_v3, %v1033_v0  ;;  %v1045_v62 = vsub.f32 %v2367_v2, %v1028_v60 }
 0x2fa   : > { %v1051_v63 = vmul.f32 1.442695, %v1046_v61  ;;  %v1049_v1 = vmul.f32 1.442695, %v1045_v62 }
 0x2fc   : > { %1829 = vpow2.f32 %v1051_v63 }
 0x2fd   : > { %1831 = vpow2.f32 %v1049_v1 }
 0x2ff   : > { %v1038_v4 = vpop.permute.xlu1 %1037 }
 0x300   : > { %v1047_v6 = vsub.f32 %v2375_v14, %v1038_v4  ;;  %v1017_v14 = vmul.f32 1.442695, %v1013_v34  ;;  %v1023_v34 = vmul.f32 1.442695, %v1016_v49  ;;  %v1058_v49 = vld [vmem:[#allocation4 + $0x8] sm:$0xff] }
 0x302   : > { %v1053_v7 = vmul.f32 1.442695, %v1047_v6 }
 0x303   : > { %v1043_v8 = vpop.permute.xlu1 %1042 }
 0x304   : > { %1833 = vpow2.f32 %v1053_v7  ;;  %v1048_v9 = vsub.f32 %v2377_v15, %v1043_v8 }
 0x306   : > { %v1830_v10 = vpop.eup %1829  ;;  %v1055_v11 = vmul.f32 1.442695, %v1048_v9 }
 0x307   : > { %v1832_v12 = vpop.eup %1831  ;;  %v1068_v16 = vsel %vm996_vm4, %v1830_v10, 0.0  ;;  %v1115_v3 = vpack.c.bf16 %v1830_v10, %v1830_v10  ;;  %v1088_v10 = vld [vmem:[#allocation5 + $0x10] sm:$0xff] }
 0x308   : > { %1835 = vpow2.f32 %v1055_v11  ;;  %1069 = vadd.xlane.f32.xlu1 %v1068_v16  ;;  %v1065_v2 = vsel %vm996_vm4, %v1832_v12, 0.0  ;;  %v1114_v17 = vpack.c.bf16 %v1832_v12, %v1832_v12  ;;  %v1089_v12 = vld [vmem:[#allocation5 + $0x18] sm:$0xff] }
 0x309   : > { %1066 = vadd.xlane.f32.xlu0 %v1065_v2  ;;  %1731 = vmatmul.mubr.msk.bf16.vlgmr.msra.gmra.mrb[8].mxu1 %vm996_vm4, %v1115_v3  ;;  %1837 = vpow2.f32 %v1017_v14 }
 0x30a   : > { %1725 = vmatmul.mubr.msk.bf16.vlgmr.msra.gmra.mrb[8].mxu0 %vm996_vm4, %v1114_v17  ;;  %1741 = vmatpush3.bf16.msra.mxu1 %v1261_v59  ;;  %1839 = vpow2.f32 %v1021_v19 }
 0x30b   : > { %1735 = vmatpush3.bf16.msra.mxu0 %v1215_v57  ;;  %1736 = vmatprep.mubr.msk.bf16.mxu0 %vm2039_vm1, %v2038_v5  ;;  %1841 = vpow2.f32 %v1023_v34  ;;  %v1086_v57 = vld [vmem:[#allocation5] sm:$0xff] }
 0x30c   : > { %1742 = vmatprep.mubr.msk.bf16.mxu1 %vm2039_vm1, %v2038_v5  ;;  %1843 = vpow2.f32 %v1019_v40 }
 0x30e   : > { %v1834_v15 = vpop.eup %1833 }
 0x30f   : > { %v1071_v20 = vsel %vm996_vm4, %v1834_v15, 0.0  ;;  %v1116_v28 = vpack.c.bf16 %v1834_v15, %v1834_v15 }
 0x310   : > { %1072 = vadd.xlane.f32.xlu0 %v1071_v20 }
 0x312   : > { %v1836_v32 = vpop.eup %1835  ;;  %1737 = vmatmul.mubr.msk.bf16.vlgmr.msra.gmra.mrb[12].mxu0 %vm996_vm4, %v1116_v28 }
 0x313   : > { %v1074_v5 = vsel %vm996_vm4, %v1836_v32, 0.0  ;;  %v1117_v21 = vpack.c.bf16 %v1836_v32, %v1836_v32  ;;  %v1838_v36 = vpop.eup %1837 }
 0x314   : > { %1075 = vadd.xlane.f32.xlu0 %v1074_v5  ;;  %v1840_v43 = vpop.eup %1839  ;;  %v1061_v24 = vmul.f32 %v1838_v36, %v1057_v22 }
 0x315   : > { %1743 = vmatmul.mubr.msk.bf16.vlgmr.msra.gmra.mrb[12].mxu1 %vm996_vm4, %v1117_v21  ;;  %v1842_v42 = vpop.eup %1841  ;;  %v1063_v31 = vmul.f32 %v1840_v43, %v1059_v27 }
 0x316   : > { %v1844_v47 = vpop.eup %1843  ;;  %v1064_v39 = vmul.f32 %v1842_v42, %v1060_v35 }
 0x317   : > { %v1062_v23 = vmul.f32 %v1844_v47, %v1058_v49 }
 0x319   : > { %1092 = vperm.xlu1 %1827, %v1838_v36  }
 0x31d   : > { %1102 = vperm.xlu1 %1827, %v1840_v43  }
 0x321   : > { %1107 = vperm.xlu1 %1827, %v1842_v42  }
 0x32a   : > { %1097 = vperm.xlu0 %1828, %v1844_v47  }
 0x395   : > { %v1070_v25 = vpop.xlane.xlu1 %1069 }
 0x396   : > { %v1067_v26 = vpop.xlane.xlu0 %1066  ;;  %v1078_v29 = vadd.f32 %v1070_v25, %v1062_v23 }
 0x397   : > { %v1077_v30 = vadd.f32 %v1067_v26, %v1061_v24 }
 0x398   : > { %1083 = vst.msk [vmem:[#allocation4 + $0x8] sm:$0xff] %vm292_vm3, %v1078_v29 }
 0x399   : > { %1082 = vst.msk [vmem:[#allocation4] sm:$0xff] %vm292_vm3, %v1077_v30  ;;  %v1093_v54 = vpop.permute.xlu1 %1092 }
 0x39a   : > { %v1110_v59 = vmul.f32 %v1093_v54, %v1086_v57 }
 0x39d   : > { %v1073_v33 = vpop.xlane.xlu0 %1072  ;;  %v1103_v0 = vpop.permute.xlu1 %1102 }
 0x39e   : > { %v1079_v37 = vadd.f32 %v1073_v33, %v1063_v31  ;;  %v1112_v11 = vmul.f32 %v1103_v0, %v1088_v10 }
 0x39f   : > { %v1319_v38 = vld [vmem:[#allocation4 + $0x8] sm:$0xff] }
 0x3a0   : > { %1084 = vst.msk [vmem:[#allocation4 + $0x10] sm:$0xff] %vm292_vm3, %v1079_v37  ;;  %1845 = vrcp.f32 %v1319_v38  ;;  %v1318_v41 = vld [vmem:[#allocation4] sm:$0xff] }
 0x3a1   : > { %v1076_v44 = vpop.xlane.xlu0 %1075  ;;  %1847 = vrcp.f32 %v1318_v41  ;;  %v1108_v16 = vpop.permute.xlu1 %1107 }
 0x3a2   : > { %v1080_v45 = vadd.f32 %v1076_v44, %v1064_v39  ;;  %v1113_v14 = vmul.f32 %v1108_v16, %v1089_v12 }
 0x3a4   : > { %1085 = vst.msk [vmem:[#allocation4 + $0x18] sm:$0xff] %vm292_vm3, %v1080_v45 }
 0x3a7   : > { %v1320_v46 = vld [vmem:[#allocation4 + $0x10] sm:$0xff] }
 0x3a8   : > { %1849 = vrcp.f32 %v1320_v46 }
 0x3a9   : > { %v1098_v56 = vpop.permute.xlu0 %1097 }
 0x3aa   : > { %v1846_v48 = vpop.eup %1845  ;;  %v1111_v58 = vmul.f32 %v1098_v56, %v1087_v55 }
 0x3ab   : > { %v1848_v50 = vpop.eup %1847  ;;  %1337 = vperm.xlu1 %1827, %v1846_v48   ;;  %v1321_v51 = vld [vmem:[#allocation4 + $0x18] sm:$0xff] }
 0x3ac   : > { %1332 = vperm.xlu0 %1828, %v1848_v50   ;;  %1851 = vrcp.f32 %v1321_v51 }
 0x3b2   : > { %v1850_v52 = vpop.eup %1849 }
 0x3b3   : > { %1342 = vperm.xlu0 %1828, %v1850_v52  }
 0x3b6   : > { %v1852_v53 = vpop.eup %1851 }
 0x3b7   : > { %1347 = vperm.xlu1 %1827, %v1852_v53  }
 0x3dc   : > { %v1205_v60 = vpop.f32.mrb[8].mxu1 }
 0x3dd   : > { %v1159_v61 = vpop.f32.mrb[8].mxu0  ;;  %v1304_v62 = vadd.f32 %v1205_v60, %v1111_v58  ;;  %v1732_v63 = vpop.f32.mrb[9].mxu1 }
 0x3de   : > { %v1303_v1 = vadd.f32 %v1159_v61, %v1110_v59  ;;  %v1726_v4 = vpop.f32.mrb[9].mxu0  ;;  %v1208_v6 = vpop.f32.mrb[10].mxu1 }
 0x3df   : > { %1308 = vst.msk [vmem:[#allocation5 + $0x8] sm:$0xff] %vm301_vm0, %v1304_v62  ;;  %v1162_v7 = vpop.f32.mrb[10].mxu0  ;;  %v1733_v8 = vpop.f32.mrb[11].mxu1 }
 0x3e0   : > { %1307 = vst.msk [vmem:[#allocation5] sm:$0xff] %vm301_vm0, %v1303_v1  ;;  %v1727_v9 = vpop.f32.mrb[11].mxu0 }
 0x3e5   : > { %v1251_v3 = vpop.f32.mrb[12].mxu0 }
 0x3e6   : > { %v1305_v2 = vadd.f32 %v1251_v3, %v1112_v11  ;;  %v1738_v17 = vpop.f32.mrb[13].mxu0  ;;  %v1327_v22 = vld [vmem:[#allocation5 + $0x8] sm:$0xff] }
 0x3e7   : > { %v1254_v15 = vpop.f32.mrb[14].mxu0  ;;  %v1326_v47 = vld [vmem:[#allocation5] sm:$0xff] }
 0x3e8   : > { %1309 = vst.msk [vmem:[#allocation5 + $0x10] sm:$0xff] %vm301_vm0, %v1305_v2  ;;  %v1739_v19 = vpop.f32.mrb[15].mxu0  ;;  %v1297_v20 = vpop.f32.mrb[12].mxu1 }
 0x3e9   : > { %v1306_v28 = vadd.f32 %v1297_v20, %v1113_v14  ;;  %v1744_v32 = vpop.f32.mrb[13].mxu1 }
 0x3ea   : > { %v1300_v34 = vpop.f32.mrb[14].mxu1 }
 0x3eb   : > { %1310 = vst.msk [vmem:[#allocation5 + $0x18] sm:$0xff] %vm301_vm0, %v1306_v28  ;;  %v1745_v5 = vpop.f32.mrb[15].mxu1 }
 0x3ef   : > { %v1328_v40 = vld [vmem:[#allocation5 + $0x10] sm:$0xff] }
 0x3f2   : > { %v1329_v23 = vld [vmem:[#allocation5 + $0x18] sm:$0xff] }
 0x42a   : > { %v1338_v36 = vpop.permute.xlu1 %1337 }
 0x42b   : > { %v1333_v21 = vpop.permute.xlu0 %1332  ;;  %v1351_v25 = vmul.f32 %v1338_v36, %v1327_v22 }
 0x42c   : > { %v1350_v49 = vmul.f32 %v1333_v21, %v1326_v47 }
 0x432   : > { %v1343_v43 = vpop.permute.xlu0 %1342 }
 0x433   : > { %v1352_v42 = vmul.f32 %v1343_v43, %v1328_v40 }
 0x435   : > { %v1354_v26 = vcombine.low %v1350_v49, %v1352_v42  ;;  %v1355_v29 = vcombine.high %v1350_v49, %v1352_v42 }
 0x436   : > { %v1348_v24 = vpop.permute.xlu1 %1347 }
 0x437   : > { %v1353_v30 = vmul.f32 %v1348_v24, %v1329_v23  ;;  %v1362_v33 = vrot.slane %v1354_v26, %v2295_v13  ;;  %v1369_v35 = vrot.slane %v1355_v29, %v2295_v13 }
 0x439   : > { %v1370_v27 = vcombine.low %v1351_v25, %v1353_v30  ;;  %v1371_v31 = vcombine.high %v1351_v25, %v1353_v30 }
 0x43b   : > { %v1378_v37 = vrot.slane %v1370_v27, %v2295_v13  ;;  %v1385_v38 = vrot.slane %v1371_v31, %v2295_v13 }
 0x43d   : > { %v1386_v39 = vcombine.low %v1362_v33, %v1378_v37  ;;  %v1387_v41 = vcombine.high %v1362_v33, %v1378_v37  ;;  %v1402_v44 = vcombine.low %v1369_v35, %v1385_v38  ;;  %v1403_v45 = vcombine.high %v1369_v35, %v1385_v38 }
 0x43f   : > { %v1394_v46 = vrot.slane %v1386_v39, %v2298_v18  ;;  %v1401_v48 = vrot.slane %v1387_v41, %v2298_v18  ;;  %v1410_v50 = vrot.slane %v1402_v44, %v2298_v18  ;;  %v1417_v51 = vrot.slane %v1403_v45, %v2298_v18 }
 0x441   : > { %v1422_v52 = vcombine.low %v1394_v46, %v1401_v48  ;;  %v1676_v53 = vcombine.high %v1394_v46, %v1401_v48  ;;  %v1438_v54 = vcombine.low %v1410_v50, %v1417_v51  ;;  %v1677_v55 = vcombine.high %v1410_v50, %v1417_v51 }
 0x443   : > { %v1429_v56 = vrot.slane %v1422_v52, %v2295_v13  ;;  %v1437_v57 = vrot.slane %v1676_v53, %v2295_v13  ;;  %v1445_v58 = vrot.slane %v1438_v54, %v2295_v13  ;;  %v1453_v59 = vrot.slane %v1677_v55, %v2295_v13 }
 0x445   : > { %v1455_v0 = vcombine.high %v1429_v56, %v1437_v57  ;;  %v1471_v60 = vcombine.high %v1445_v58, %v1453_v59  ;;  %v1454_v61 = vcombine.low %v1429_v56, %v1437_v57  ;;  %v1470_v62 = vcombine.low %v1445_v58, %v1453_v59 }
 0x447   : > { %v1469_v63 = vrot.slane %v1455_v0, %v2298_v18  ;;  %v1485_v1 = vrot.slane %v1471_v60, %v2298_v18  ;;  %v1462_v4 = vrot.slane %v1454_v61, %v2298_v18  ;;  %v1478_v6 = vrot.slane %v1470_v62, %v2298_v18 }
 0x449   : > { %v1488_v7 = vcombine.low %v1469_v63, %v1485_v1  ;;  %v1487_v8 = vcombine.high %v1462_v4, %v1478_v6  ;;  %v1486_v9 = vcombine.low %v1462_v4, %v1478_v6  ;;  %v1489_v13 = vcombine.high %v1469_v63, %v1485_v1 }
 0x44b   : > { %1495 = vrot.lane.b32.xlu1 %v1488_v7, %s2037_s18  ;;  %1491 = vrot.lane.b32.xlu0 %v1487_v8, %s2035_s7 }
 0x44f   : > { %1499 = vrot.lane.b32.xlu0 %v1489_v13, %s2036_s20 }
 0x4bd   : > { %v1492_v10 = vpop.permute.xlu0 %1491  ;;  %v1496_v11 = vpop.permute.xlu1 %1495 }
 0x4be   : > { %v1502_v12 = vsel %vm301_vm0, %v1486_v9, %v1492_v10 }
 0x4bf   : > { %v1504_v16 = vsel %vm1503_vm6, %v1502_v12, %v1496_v11 }
 0x4c1   : > { %v1500_v18 = vpop.permute.xlu0 %1499 }
 0x4c2   : > { %v1506_v3 = vsel %vm1505_vm7, %v1504_v16, %v1500_v18 }
 0x4c3   : > { %1507 = vst [vmem:[%s286_s6] sm:$0xff] %v1506_v3 }
 0x4c4   : > { %1956 = shalt.err (!%p1953_p13)
}
 0x4c5   : > { %s1957_s21 = scalar_lea.hbm %s2514_s30, 128  ;;  %s1961_s16 = scalar_lea.hbm %s2566_s3, 256 }
 0x4c6   : > { %p1958_p11 = scmp.ne.s32.totalorder %s2514_s30, %s1957_s21  ;;  %p1962_p7 = scmp.lt.u32.totalorder %s2514_s30, %s2566_s3 }
 0x4c7   : > { %p1963_p3 = scmp.lt.u32.totalorder %s1961_s16, %s1957_s21  ;;  %p1965_p4 = scmp.lt.u32.totalorder %s1957_s21, %s2514_s30 }
 0x4c8   : > { %p1959_p2 = pnand %p1958_p11, %p2589_p10 }
 0x4c9   : > { %p1964_p0 = por %p1963_p3, %p1962_p7 }
 0x4ca   : > { %p1960_p5 = pneg %p1959_p2 }
 0x4cb   : > { %p1966_p12 = por %p1965_p4, %p1964_p0 }
 0x4cd   : > { %p1967_p1 = pnand %p1966_p12, %p1960_p5 }
 0x4cf   : > { %1970 = shalt.err (!%p1967_p1)
}
 0x4d0   : > { %1752 = dma.vmem_to_hbm [thread:$0]  (%p2589_p10), %s2516_s9, 128, %s2514_s30, %s1509_s1  }
 0x4d1 PF: > { %s1535_s19 = sand.u32 1, %s2009_s12   ;;  %p2590_p8 = scmp.ne.s32.totalorder %s2579_s27, 0 }
 0x4d2   : > { %p2591_p9 = scmp.ge.s32.totalorder %s2029_s17, 2  ;;  %s1536_s7 = scalar_lea.sflag [#allocation8], %s1535_s19 }
 0x4d4   : > { %p1765_p6 = pnand %p2591_p9, %p2590_p8 }
 0x4d6   : > { %2004 = dma.done.wait (!%p1765_p6), %s1536_s7, 128  }
 0x4d7   : > { %2006 = vsyncadd (!%p1765_p6), %s1536_s7, 4294967168  ;;  %s22_s17 = sadd.s32 1, %s2029_s17   ;;  %s2592_s25 = sld [smem:[#allocation18_spill]] }
 0x4d8   : > { %p19_p13 = scmp.ge.s32.totalorder %s22_s17, 4   ;;  %s2593_s15 = sld [smem:[#allocation16_spill]] }
 0x4d9   : > { %s2594_s16 = sld [smem:[#allocation17_spill]]  ;;  %s2595_s12 = smov %s2013_s13 }
 0x4da   : > { %s2596_s13 = smov %s2017_s14  ;;  %21 = sbr.rel (!%p19_p13) target bundleno = 10 (0xa), region = 109 }
 0x4dd   : > { %s2597_s14 = smov %s2592_s25 }
 0x4e1   :  { %1541 = vsyncpa [#allocation7], 1 }
 0x4e2   :  { %1543 = vsyncpa [#allocation7 + $0x1], 1 }
 0x4e3   :  { %1544 = vsyncpa [#allocation10], 1 }
 0x4e4   :  { %1546 = vsyncpa [#allocation10 + $0x1], 1 }
 0x4e5   :  { %1547 = vsyncpa [#allocation8], 1 }
 0x4e6   :  { %1549 = vsyncpa [#allocation8 + $0x1], 1 }

</bundles_post_ra>
